<compile_context>
chip_gen: v7x
topology: tpu7x:2x2x1
jax: 0.10.0
libtpu: 0.0.40
codegen_flags: <defaults>
</compile_context>

<pallas_src>
import functools

import jax
import jax.numpy as jnp
from jax.experimental import pallas as pl
from jax.experimental.pallas import tpu as pltpu

VMEM_LIMIT = 32 * 1024 * 1024   # safe on v5e/v6e (128 MiB phys) and v7x (64 MiB phys)
ROW_TILE_CAP = 512              # max rows per tile / per in-kernel row block


def _round_up(x, m):
    return (x + m - 1) // m * m


def _compiler_params():
    return pltpu.CompilerParams(
        dimension_semantics=("parallel",),
        vmem_limit_bytes=VMEM_LIMIT)


# --------------------------------------------------------------------------
# Kernel 1: 1x1 conv = full-K GEMM + folded-BN shift + ReLU
# --------------------------------------------------------------------------
def _gemm_bias_relu_kernel(a_ref, w_ref, b_ref, o_ref):
    y = jnp.dot(a_ref[...], w_ref[...], preferred_element_type=jnp.float32)
    o_ref[...] = jnp.maximum(y + b_ref[...], 0.0)


def _pick_row_tile(m, cap=ROW_TILE_CAP):
    """Largest tile <= cap that is a multiple of 8 and divides m (no padding copy);
    otherwise fall back to a padded tile."""
    top = min(cap, _round_up(m, 8))
    t = top - top % 8
    while t >= 8:
        if m % t == 0:
            return t, m
        t -= 8
    t = min(cap, _round_up(m, 8))
    return t, _round_up(m, t)


def gemm_bias_relu(a, w, b):
    """relu(a @ w + b). a:(M,K), w:(K,N) bf16 (BN scale folded), b:(1,N) f32."""
    M, K = a.shape
    Nout = w.shape[1]
    a = a.astype(jnp.bfloat16)
    if K % 8:  # only the 3-channel stem convs hit this
        Kp = _round_up(K, 8)
        a = jnp.pad(a, ((0, 0), (0, Kp - K)))
        w = jnp.pad(w, ((0, Kp - K), (0, 0)))
        K = Kp
    tm, Mp = _pick_row_tile(M)
    if Mp != M:
        a = jnp.pad(a, ((0, Mp - M), (0, 0)))

    out = pl.pallas_call(
        _gemm_bias_relu_kernel,
        out_shape=jax.ShapeDtypeStruct((Mp, Nout), jnp.float32),
        grid_spec=pltpu.PrefetchScalarGridSpec(
            num_scalar_prefetch=0,
            grid=(Mp // tm,),
            in_specs=[
                pl.BlockSpec((tm, K), lambda i: (i, 0)),
                pl.BlockSpec((K, Nout), lambda i: (0, 0)),   # resident
                pl.BlockSpec((1, Nout), lambda i: (0, 0)),   # resident
            ],
            out_specs=pl.BlockSpec((tm, Nout), lambda i: (i, 0)),
        ),
        compiler_params=_compiler_params(),
    )(a, w.astype(jnp.bfloat16), b)
    return out[:M] if Mp != M else out


# --------------------------------------------------------------------------
# Flat-offset geometry for stride-1 kxk windows over a padded NHWC image.
# Output row g = h*Wp + w reads input rows g + (kh*Wp + kw); rows with
# w >= Wout are garbage and are sliced off on the host.
# --------------------------------------------------------------------------
def _flat_geometry(x_shape, k, pad):
    N, H, W, C = x_shape
    Hp, Wp = H + 2 * pad, W + 2 * pad
    Hout, Wout = Hp - k + 1, Wp - k + 1
    m = Hout * Wp                             # flat output rows per image
    nblk = -(-m // ROW_TILE_CAP)
    tm = _round_up(-(-m // nblk), 8)
    mp = nblk * tm
    dmax = (k - 1) * (Wp + 1)
    rin = _round_up(mp + dmax, 8)
    taps = tuple(kh * Wp + kw for kh in range(k) for kw in range(k))
    return dict(N=N, H=H, W=W, C=C, Hp=Hp, Wp=Wp, Hout=Hout, Wout=Wout,
                m=m, nblk=nblk, tm=tm, mp=mp, rin=rin, taps=taps, pad=pad)


def _flat_pad_input(x, geo, dtype, pad_value=0.0):
    p = geo["pad"]
    x = x.astype(dtype)
    xp = jnp.pad(x, ((0, 0), (p, p), (p, p), (0, 0)), constant_values=pad_value)
    xf = xp.reshape(geo["N"], geo["Hp"] * geo["Wp"], geo["C"])
    extra = geo["rin"] - geo["Hp"] * geo["Wp"]
    return jnp.pad(xf, ((0, 0), (0, extra), (0, 0)), constant_values=pad_value)


def _unflatten(yf, geo):
    n = yf.shape[0]
    cout = yf.shape[-1]
    y = yf[:, :geo["Hout"] * geo["Wp"], :].reshape(n, geo["Hout"], geo["Wp"], cout)
    return y[:, :, :geo["Wout"], :]


# --------------------------------------------------------------------------
# Kernel 2: kxk conv (stride 1) via fused im2col (static tap offsets in-kernel)
# --------------------------------------------------------------------------
def _convk_kernel(x_ref, w_ref, b_ref, o_ref, acc_ref, *, taps, tm, nblk):
    # x_ref: (1, Rin, Cin) bf16 flat-padded image; w_ref: (k*k, Cin, Cout) bf16
    # o_ref: (1, Mp, Cout) f32 flat-layout output; acc_ref: (tm, Cout) f32 scratch
    for i in range(nblk):
        base = i * tm
        for t, d in enumerate(taps):
            part = jnp.dot(x_ref[0, base + d:base + d + tm, :], w_ref[t],
                           preferred_element_type=jnp.float32)
            if t == 0:
                acc_ref[...] = part
            else:
                acc_ref[...] += part
        o_ref[0, base:base + tm, :] = jnp.maximum(acc_ref[...] + b_ref[...], 0.0)


def conv_kxk(p, x):
    geo = _flat_geometry(x.shape, p["k"], p["pad"])
    xf = _flat_pad_input(x, geo, jnp.bfloat16)
    cout = p["b"].shape[-1]
    out = pl.pallas_call(
        functools.partial(_convk_kernel, taps=geo["taps"], tm=geo["tm"],
                          nblk=geo["nblk"]),
        out_shape=jax.ShapeDtypeStruct((geo["N"], geo["mp"], cout), jnp.float32),
        grid_spec=pltpu.PrefetchScalarGridSpec(
            num_scalar_prefetch=0,
            grid=(geo["N"],),
            in_specs=[
                pl.BlockSpec((1, geo["rin"], geo["C"]), lambda n: (n, 0, 0)),
                pl.BlockSpec(p["w"].shape, lambda n: (0, 0, 0)),
                pl.BlockSpec((1, cout), lambda n: (0, 0)),
            ],
            out_specs=pl.BlockSpec((1, geo["mp"], cout), lambda n: (n, 0, 0)),
            scratch_shapes=[pltpu.VMEM((geo["tm"], cout), jnp.float32)],
        ),
        compiler_params=_compiler_params(),
    )(xf, p["w"], p["b"])
    return _unflatten(out, geo)


# --------------------------------------------------------------------------
# Kernel 3: L2Pooling(3,1,1) fused with the pool-branch 1x1 ConvModule
# --------------------------------------------------------------------------
def _l2pool_conv_kernel(x_ref, w_ref, b_ref, o_ref, acc_ref, *,
                        taps, tm, nblk, inv_win):
    for i in range(nblk):
        base = i * tm
        for t, d in enumerate(taps):
            xs = x_ref[0, base + d:base + d + tm, :].astype(jnp.float32)
            sq = xs * xs
            if t == 0:
                acc_ref[...] = sq
            else:
                acc_ref[...] += sq
        pooled = jnp.sqrt(acc_ref[...] * inv_win).astype(jnp.bfloat16)
        y = jnp.dot(pooled, w_ref[...], preferred_element_type=jnp.float32)
        o_ref[0, base:base + tm, :] = jnp.maximum(y + b_ref[...], 0.0)


def l2pool_conv1x1(p, x):
    geo = _flat_geometry(x.shape, 3, 1)
    xf = _flat_pad_input(x, geo, jnp.bfloat16)     # zero pad == count_include_pad
    cout = p["b"].shape[-1]
    out = pl.pallas_call(
        functools.partial(_l2pool_conv_kernel, taps=geo["taps"], tm=geo["tm"],
                          nblk=geo["nblk"], inv_win=1.0 / 9.0),
        out_shape=jax.ShapeDtypeStruct((geo["N"], geo["mp"], cout), jnp.float32),
        grid_spec=pltpu.PrefetchScalarGridSpec(
            num_scalar_prefetch=0,
            grid=(geo["N"],),
            in_specs=[
                pl.BlockSpec((1, geo["rin"], geo["C"]), lambda n: (n, 0, 0)),
                pl.BlockSpec(p["w"].shape, lambda n: (0, 0)),
                pl.BlockSpec((1, cout), lambda n: (0, 0)),
            ],
            out_specs=pl.BlockSpec((1, geo["mp"], cout), lambda n: (n, 0, 0)),
            scratch_shapes=[pltpu.VMEM((geo["tm"], geo["C"]), jnp.float32)],
        ),
        compiler_params=_compiler_params(),
    )(xf, p["w"], p["b"])
    return _unflatten(out, geo)


# --------------------------------------------------------------------------
# Kernel 4: MaxPool2d(3, stride 2, pad 1) = stride-1 running max + host [::2]
# --------------------------------------------------------------------------
def _maxpool_s1_kernel(x_ref, o_ref, acc_ref, *, taps, tm, nblk):
    for i in range(nblk):
        base = i * tm
        acc_ref[...] = x_ref[0, base:base + tm, :]
        for d in taps[1:]:
            acc_ref[...] = jnp.maximum(acc_ref[...],
                                       x_ref[0, base + d:base + d + tm, :])
        o_ref[0, base:base + tm, :] = acc_ref[...]


def maxpool_3_2_1(x):
    geo = _flat_geometry(x.shape, 3, 1)
    xf = _flat_pad_input(x, geo, jnp.float32, pad_value=-jnp.inf)
    c = geo["C"]
    out = pl.pallas_call(
        functools.partial(_maxpool_s1_kernel, taps=geo["taps"], tm=geo["tm"],
                          nblk=geo["nblk"]),
        out_shape=jax.ShapeDtypeStruct((geo["N"], geo["mp"], c), jnp.float32),
        grid_spec=pltpu.PrefetchScalarGridSpec(
            num_scalar_prefetch=0,
            grid=(geo["N"],),
            in_specs=[pl.BlockSpec((1, geo["rin"], c), lambda n: (n, 0, 0))],
            out_specs=pl.BlockSpec((1, geo["mp"], c), lambda n: (n, 0, 0)),
            scratch_shapes=[pltpu.VMEM((geo["tm"], c), jnp.float32)],
        ),
        compiler_params=_compiler_params(),
    )(xf)
    y = _unflatten(out, geo)        # 3x3 stride-1 max, shape (N, H, W, C)
    return y[:, ::2, ::2, :]        # stride-2 subsample == MaxPool2d(3, 2, 1)


# --------------------------------------------------------------------------
# Kernel 5: head = AdaptiveAvgPool2d(1) + Flatten + Dropout(eval) + FC + Sigmoid
# --------------------------------------------------------------------------
def _head_kernel(x_ref, w_ref, b_ref, o_ref):
    # x_ref: (N, HW, C) f32; w_ref: (1, C) f32; b_ref: (1, 1) f32; o_ref: (N, 1)
    for n in range(x_ref.shape[0]):
        feat = jnp.mean(x_ref[n], axis=0, keepdims=True)                 # (1, C)
        logit = jnp.sum(feat * w_ref[...], axis=-1, keepdims=True) + b_ref[...]
        o_ref[n:n + 1, :] = jax.nn.sigmoid(logit)


def avgpool_fc_sigmoid(x, w_row, bias):
    n, h, w, c = x.shape
    xf = x.reshape(n, h * w, c)
    return pl.pallas_call(
        _head_kernel,
        out_shape=jax.ShapeDtypeStruct((n, 1), jnp.float32),
        grid_spec=pltpu.PrefetchScalarGridSpec(
            num_scalar_prefetch=0,
            grid=(1,),
            in_specs=[
                pl.BlockSpec((n, h * w, c), lambda i: (0, 0, 0)),
                pl.BlockSpec((1, c), lambda i: (0, 0)),
                pl.BlockSpec((1, 1), lambda i: (0, 0)),
            ],
            out_specs=pl.BlockSpec((n, 1), lambda i: (0, 0)),
        ),
        compiler_params=_compiler_params(),
    )(xf, w_row, bias)


# --------------------------------------------------------------------------
# Parameters (BN folded, bf16, built once)
# --------------------------------------------------------------------------
def _trunc_normal(key, shape, std=0.01):
    # trunc_normal_(std=0.01, a=-2, b=2): bounds are ~200 sigma -> plain normal.
    return std * jax.random.normal(key, shape, jnp.float32)


def make_conv(key, cin, cout, k, pad=0):
    """ConvModule = Conv2d(bias=False) + BatchNorm2d(eps=1e-3, eval) + ReLU.
    BN scale is folded into the weights; BN shift kept as the epilogue bias."""
    w = _trunc_normal(key, (k, k, cin, cout))
    gamma = jnp.ones((cout,), jnp.float32)
    beta = jnp.zeros((cout,), jnp.float32)
    rmean = jnp.zeros((cout,), jnp.float32)
    rvar = jnp.ones((cout,), jnp.float32)
    scale = gamma / jnp.sqrt(rvar + 1e-3)
    shift = beta - rmean * scale
    w_f = w * scale
    wm = w_f.reshape(cin, cout) if k == 1 else w_f.reshape(k * k, cin, cout)
    return dict(w=wm.astype(jnp.bfloat16),
                b=shift.reshape(1, cout).astype(jnp.float32),
                k=k, pad=pad)


def apply_conv(p, x):
    if p["k"] == 1:
        n, h, w, c = x.shape
        y = gemm_bias_relu(x.reshape(n * h * w, c), p["w"], p["b"])
        return y.reshape(n, h, w, -1)
    return conv_kxk(p, x)


def make_inception(key, in_c, ch1, ch3r, ch3, ch5r, ch5, chp):
    ks = jax.random.split(key, 6)
    b1 = make_conv(ks[0], in_c, ch1, 1)
    b2a = make_conv(ks[1], in_c, ch3r, 1)
    b3a = make_conv(ks[2], in_c, ch5r, 1)
    # Merge the three 1x1 convs that share the same input into one GEMM.
    w1x1 = jnp.concatenate([b1["w"], b2a["w"], b3a["w"]], axis=1)
    b1x1 = jnp.concatenate([b1["b"], b2a["b"], b3a["b"]], axis=1)
    return dict(w1x1=w1x1, b1x1=b1x1, splits=(ch1, ch3r, ch5r),
                b2b=make_conv(ks[3], ch3r, ch3, 3, pad=1),
                b3b=make_conv(ks[4], ch5r, ch5, 5, pad=2),
                b4=make_conv(ks[5], in_c, chp, 1))


def apply_inception(p, x):
    n, h, w, c = x.shape
    ch1, ch3r, ch5r = p["splits"]
    ym = gemm_bias_relu(x.reshape(n * h * w, c), p["w1x1"], p["b1x1"])
    y1 = ym[:, :ch1].reshape(n, h, w, ch1)
    y2a = ym[:, ch1:ch1 + ch3r].reshape(n, h, w, ch3r)
    y3a = ym[:, ch1 + ch3r:].reshape(n, h, w, ch5r)
    y2 = conv_kxk(p["b2b"], y2a)         # 3x3, pad 1
    y3 = conv_kxk(p["b3b"], y3a)         # 5x5, pad 2
    y4 = l2pool_conv1x1(p["b4"], x)      # L2Pool(3,1,1) + 1x1 conv, fused
    return jnp.concatenate([y1, y2, y3, y4], axis=-1)


# --------------------------------------------------------------------------
# FaceNet (eval-mode forward)
# --------------------------------------------------------------------------
def make_facenet_params(key):
    ks = iter(jax.random.split(key, 16))
    p = {}
    p["conv1"] = make_conv(next(ks), 3, 3, 1)
    p["conv2"] = make_conv(next(ks), 3, 64, 1)
    p["conv3"] = make_conv(next(ks), 64, 192, 3, pad=1)
    p["inc1a"] = make_inception(next(ks), 192, 64, 96, 128, 16, 32, 32)
    p["inc1b"] = make_inception(next(ks), 256, 128, 128, 192, 32, 96, 64)
    p["inc2a"] = make_inception(next(ks), 480, 192, 96, 208, 16, 48, 64)
    p["inc2b"] = make_inception(next(ks), 512, 160, 112, 224, 24, 64, 64)
    p["inc2c"] = make_inception(next(ks), 512, 128, 128, 256, 24, 64, 64)
    p["inc2d"] = make_inception(next(ks), 512, 112, 144, 288, 32, 64, 64)
    p["inc2e"] = make_inception(next(ks), 528, 256, 160, 320, 32, 128, 128)
    p["inc3a"] = make_inception(next(ks), 832, 256, 160, 320, 32, 128, 128)
    p["inc3b"] = make_inception(next(ks), 832, 384, 192, 384, 48, 128, 128)
    p["fc_w"] = _trunc_normal(next(ks), (1, 1024))     # Linear(1024, 1) weight row
    p["fc_b"] = _trunc_normal(next(ks), (1, 1))
    return p


def facenet_forward(params, x_nchw):
    """Eval-mode forward. Input (N, 3, H, W) NCHW like PyTorch; output (N, 1)."""
    x = jnp.transpose(x_nchw, (0, 2, 3, 1)).astype(jnp.float32)   # -> NHWC
    x = apply_conv(params["conv1"], x)
    x = apply_conv(params["conv2"], x)
    x = apply_conv(params["conv3"], x)
    x = maxpool_3_2_1(x)
    x = apply_inception(params["inc1a"], x)
    x = apply_inception(params["inc1b"], x)
    x = maxpool_3_2_1(x)
    x = apply_inception(params["inc2a"], x)
    x = apply_inception(params["inc2b"], x)
    x = apply_inception(params["inc2c"], x)
    x = apply_inception(params["inc2d"], x)
    x = apply_inception(params["inc2e"], x)
    x = maxpool_3_2_1(x)
    x = apply_inception(params["inc3a"], x)
    x = apply_inception(params["inc3b"], x)
    # avgpool + flatten + dropout(identity in eval) + fc + sigmoid, fused:
    return avgpool_fc_sigmoid(x, params["fc_w"], params["fc_b"])


if __name__ == "__main__":
    key = jax.random.PRNGKey(0)
    pkey, xkey = jax.random.split(key)
    params = make_facenet_params(pkey)
    x = jax.random.normal(xkey, (2, 3, 56, 56), jnp.float32)  # Nx3x56x56

    out = facenet_forward(params, x)
    out = jax.block_until_ready(out)

    assert out.shape == (2, 1), out.shape
    assert bool(jnp.all(jnp.isfinite(out)))
    assert bool(jnp.all((out >= 0.0) & (out <= 1.0)))
    print("KERNEL_OK")
</pallas_src>

<mosaic_0001>
module attributes {stable_mosaic.version = 11 : i64} {
  func.func @_gemm_bias_relu_kernel(%arg0: i32, %arg1: memref<448x8xbf16, #tpu.memory_space<vmem>>, %arg2: memref<8x3xbf16, #tpu.memory_space<vmem>>, %arg3: memref<1x3xf32, #tpu.memory_space<vmem>>, %arg4: memref<448x3xf32, #tpu.memory_space<vmem>>) attributes {dimension_semantics = [#tpu.dimension_semantics<parallel>], iteration_bounds = array<i64: 14>, scalar_prefetch = 0 : i64, scratch_operands = 0 : i64, tpu.core_type = #tpu.core_type<tc>, window_params = [{transform_indices = @transform_0, window_bounds = array<i64: 448, 8>}, {pipeline_mode = #tpu.pipeline_mode<synchronous>, transform_indices = @transform_1, window_bounds = array<i64: 8, 3>}, {pipeline_mode = #tpu.pipeline_mode<synchronous>, transform_indices = @transform_2, window_bounds = array<i64: 1, 3>}, {transform_indices = @transform_3, window_bounds = array<i64: 448, 3>}]} {
    %c0 = arith.constant 0 : index
    %c0_0 = arith.constant 0 : index
    %0 = vector.load %arg1[%c0, %c0_0] : memref<448x8xbf16, #tpu.memory_space<vmem>>, vector<448x8xbf16>
    %c0_1 = arith.constant 0 : index
    %c0_2 = arith.constant 0 : index
    %1 = vector.load %arg2[%c0_1, %c0_2] : memref<8x3xbf16, #tpu.memory_space<vmem>>, vector<8x3xbf16>
    %cst = arith.constant dense<0.000000e+00> : vector<448x3xf32>
    %2 = tpu.matmul %0, %1, %cst {dimension_numbers = #tpu.dot_dimension_numbers<[1], [0], [0], [1], [0, 0, 1, 1], [], []>} : vector<448x8xbf16>, vector<8x3xbf16>, vector<448x3xf32> -> vector<448x3xf32>
    %c0_3 = arith.constant 0 : index
    %c0_4 = arith.constant 0 : index
    %3 = vector.load %arg3[%c0_3, %c0_4] : memref<1x3xf32, #tpu.memory_space<vmem>>, vector<1x3xf32>
    %4 = vector.broadcast %3 : vector<1x3xf32> to vector<448x3xf32>
    %5 = arith.addf %2, %4 : vector<448x3xf32>
    %cst_5 = arith.constant 0.000000e+00 : f32
    %6 = vector.broadcast %cst_5 : f32 to vector<448x3xf32>
    %7 = arith.maximumf %5, %6 : vector<448x3xf32>
    %c0_6 = arith.constant 0 : index
    %c0_7 = arith.constant 0 : index
    %8 = vector.load %arg4[%c0_6, %c0_7] : memref<448x3xf32, #tpu.memory_space<vmem>>, vector<448x3xf32>
    tpu.vector_store %arg4[%c0_6, %c0_7], %7 {strides = array<i32>} : memref<448x3xf32, #tpu.memory_space<vmem>>, vector<448x3xf32>,
    return
  }
  func.func @transform_0(%arg0: i32) -> (i32, i32) {
    %c0_i32 = arith.constant 0 : i32
    %c0_i32_0 = arith.constant 0 : i32
    return %arg0, %c0_i32 : i32, i32
  }
  func.func @transform_1(%arg0: i32) -> (i32, i32) {
    %c0_i32 = arith.constant 0 : i32
    %c0_i32_0 = arith.constant 0 : i32
    %c0_i32_1 = arith.constant 0 : i32
    return %c0_i32, %c0_i32_0 : i32, i32
  }
  func.func @transform_2(%arg0: i32) -> (i32, i32) {
    %c0_i32 = arith.constant 0 : i32
    %c0_i32_0 = arith.constant 0 : i32
    %c0_i32_1 = arith.constant 0 : i32
    return %c0_i32, %c0_i32_0 : i32, i32
  }
  func.func @transform_3(%arg0: i32) -> (i32, i32) {
    %c0_i32 = arith.constant 0 : i32
    %c0_i32_0 = arith.constant 0 : i32
    return %arg0, %c0_i32 : i32, i32
  }
}

</mosaic_0001>

<bundles_post_ra>
// kernel: tpu_custom_call.1
= control target key start
LH: loop header
LB: loop body
LE: loop exit
PB: predicated region body
PF: predicated region fallthrough
CT: control target
= control target key end

     0   :  { %8 = vsyncpa [#allocation3], 0  ;;  %s1186_s12 = smov 0   ;;  %s1482_s0 = inlined_call_operand.vmem [shape: bf16[6272,8], index: 0, kind: input, shape index: {}]   ;;  %s1483_s1 = inlined_call_operand.vmem [shape: bf16[8,3], index: 1, kind: input, shape index: {}]   ;;  %s1484_s2 = inlined_call_operand.hbm [shape: f32[1,3], index: 2, kind: input, shape index: {}]   ;;  %s1485_s3 = inlined_call_operand.vmem [shape: f32[6272,3], index: 3, kind: output, shape index: {}]  }
   0x1 LB: > { %s919_s13 = sadd.s32 4294967295, %s1163_s12   ;;  %p921_p0 = scmp.ge.s32.totalorder %s1163_s12, 1  ;;  %s1163_s12 = sphi %s1186_s12, %s14_s12  }
   0x2   : > { %p113_p1 = scmp.lt.s32.totalorder %s1163_s12, 15  ;;  %p1200_p3 = scmp.eq.s32.totalorder %s919_s13, 0 }
   0x3   : > { %s1165_s16 = smov [#allocation2]   ;;  %s1125_s21 = scalar_lea.hbm %s1484_s2, 16 }
   0x4   : > { %p1194_p2 = pnand %p921_p0, %p113_p1  ;;  %s129_s17 = sshll.u32 %s1165_s16, 4  ;;  %s130_s17 = int_to_ptr.vmem [resolvable:$true] %s129_s17 }
   0x5   : > { %s1490_s15 = scalar_select %p1200_p3, 1, 0 }
   0x6   : > { %s1489_s14 = scalar_select %p1194_p2, 1, 0 }
   0x7   : > { %p1082_p4 = pneg %p1194_p2  ;;  %p1126_p6 = scmp.ne.s32.totalorder %s1484_s2, %s1125_s21 }
   0x8   : > { %p1132_p10 = scmp.lt.u32.totalorder %s1125_s21, %s1484_s2 }
   0x9   : > { %p1208_p5 = pnand %p1200_p3, %p1082_p4 }
   0xb   : > { %p1127_p7 = pneg %p1208_p5 }
   0xd   : > { %p1128_p8 = pnand %p1127_p7, %p1126_p6 }
   0xf   : > { %p1129_p9 = pneg %p1128_p8 }
  0x11   : > { %p1134_p11 = pnand %p1132_p10, %p1129_p9 }
  0x13   : > { %1137 = shalt.err (!%p1134_p11)
}
  0x14   : > { %s1138_s26 = scalar_lea.vmem %s130_s17, 16  ;;  %s1145_s27 = scalar_lea.vmem %s130_s17, 32 }
  0x15   : > { %p1139_p12 = scmp.ne.s32.totalorder %s130_s17, %s1138_s26  ;;  %p1146_p1 = scmp.lt.s32.totalorder %s130_s17, %s130_s17 }
  0x16   : > { %p1147_p4 = scmp.lt.s32.totalorder %s1145_s27, %s1138_s26 }
  0x17   : > { %p1141_p13 = pnand %p1139_p12, %p1127_p7 }
  0x18   : > { %p1148_p3 = por %p1147_p4, %p1146_p1 }
  0x19   : > { %p1142_p0 = pneg %p1141_p13 }
  0x1b   : > { %p1149_p2 = pnand %p1148_p3, %p1142_p0 }
  0x1d   : > { %1152 = shalt.err (!%p1149_p2)
}
  0x1e   : > { %1085 = dma.hbm_to_vmem [thread:$0]  (!%p1208_p5), %s1484_s2, 16, %s130_s17, [#allocation3]  }
  0x1f   : > { %p1492_p6 = scmp.ne.s32.totalorder %s1489_s14, 0 }
  0x20   : > { %p1493_p8 = scmp.ne.s32.totalorder (!%p1492_p6), %s1490_s15, 0 }
  0x21   : > { %151 = sbr.rel (%p1492_p6) target bundleno = 318 (0x13e), region = 32 }
  0x28   : > { %1158 = dma.done.wait (%p1493_p8), [#allocation3], 16  }
  0x29   : > { %1160 = vsyncadd (%p1493_p8), [#allocation3], 4294967280  ;;  %s175_s30 = smul.u32 56, %s919_s13  ;;  %vm477_vm0 = vcmask 1043456   ;;  %v244_v0 = vld [vmem:[%s1483_s1] sm:$0xf] }
  0x2a   : > { %vm392_vm1 = vcmask 64512   ;;  %1076 = vmatprep.subr.msk.bf16.mxu0 %vm477_vm0, %v244_v0  ;;  %1077 = vmatprep.subr.msk.bf16.mxu1 %vm477_vm0, %v244_v0  ;;  %v479_v1 = vsel %vm477_vm0, %v244_v0, 0  ;;  %v1303_v30 = vld [vmem:[#allocation2] ss:$0 sm:$0xff]  ;;  %vm794_vm2 = vcmask 23552  }
  0x2b   : > { %p176_p3 = scmp.lt.s32.totalorder %s175_s30, 783  ;;  %1017 = vmatpush3.bf16.msra.mxu0 %v479_v1  ;;  %1075 = vmatpush3.bf16.msra.mxu1 %v479_v1 }
  0x2d   : > { %s1495_s30 = smov (!%p176_p3, %s175_s30), 783 }
  0x2e   : > { %s926_s4 = sshll.u32 %s1495_s30, 2  ;;  %s927_s10 = sshll.u32 %s1495_s30, 3 }
  0x2f   : > { %s1245_s9 = scalar_lea.vmem %s1482_s0, %s926_s4  ;;  %s1310_s14 = scalar_lea.vmem %s1485_s3, %s927_s10 }
  0x30   : > { %v1097_v2 = vld [vmem:[%s1245_s9] sm:$0xff]   ;;  %v1098_v3 = vld [vmem:[%s1245_s9 + $0x70] sm:$0xff]   ;;  %v1099_v4 = vld [vmem:[%s1245_s9 + $0x8] sm:$0xff]  }
  0x31   : > { %1018 = vmatprep.mubr.msk.bf16.mxu0 %vm392_vm1, %v1097_v2  ;;  %1046 = vmatprep.mubr.msk.bf16.mxu1 %vm392_vm1, %v1098_v3  ;;  %v1100_v5 = vld [vmem:[%s1245_s9 + $0x78] sm:$0xff]   ;;  %v1101_v6 = vld [vmem:[%s1245_s9 + $0x10] sm:$0xff]   ;;  %v1102_v7 = vld [vmem:[%s1245_s9 + $0x80] sm:$0xff]  }
  0x32   : > { %1019 = vmatmul.mubr.msk.bf16.vlgmr.msra.gmra.mrb[0].mxu0 %vm392_vm1, %v1099_v4  ;;  %1047 = vmatmul.mubr.msk.bf16.vlgmr.msra.gmra.mrb[0].mxu1 %vm392_vm1, %v1100_v5  ;;  %v1103_v8 = vld [vmem:[%s1245_s9 + $0x18] sm:$0xff]   ;;  %v1104_v9 = vld [vmem:[%s1245_s9 + $0x88] sm:$0xff]   ;;  %v1105_v10 = vld [vmem:[%s1245_s9 + $0x20] sm:$0xff]  }
  0x33   : > { %1022 = vmatprep.mubr.msk.bf16.mxu0 %vm392_vm1, %v1101_v6  ;;  %1050 = vmatprep.mubr.msk.bf16.mxu1 %vm392_vm1, %v1102_v7  ;;  %v1106_v11 = vld [vmem:[%s1245_s9 + $0x90] sm:$0xff]   ;;  %v1107_v12 = vld [vmem:[%s1245_s9 + $0x28] sm:$0xff]   ;;  %v1108_v13 = vld [vmem:[%s1245_s9 + $0x98] sm:$0xff]  }
  0x34   : > { %v1109_v14 = vld [vmem:[%s1245_s9 + $0x30] sm:$0xff]   ;;  %v1110_v15 = vld [vmem:[%s1245_s9 + $0xa0] sm:$0xff]   ;;  %v1111_v16 = vld [vmem:[%s1245_s9 + $0x38] sm:$0xff]  }
  0x35   : > { %v1112_v17 = vld [vmem:[%s1245_s9 + $0xa8] sm:$0xff]   ;;  %v1113_v18 = vld [vmem:[%s1245_s9 + $0x40] sm:$0xff]   ;;  %v1114_v19 = vld [vmem:[%s1245_s9 + $0xb0] sm:$0xff]  }
  0x36   : > { %v1115_v20 = vld [vmem:[%s1245_s9 + $0x48] sm:$0xff]   ;;  %v1116_v21 = vld [vmem:[%s1245_s9 + $0xb8] sm:$0xff]   ;;  %v1117_v22 = vld [vmem:[%s1245_s9 + $0x50] sm:$0xff]  }
  0x37   : > { %v1118_v23 = vld [vmem:[%s1245_s9 + $0xc0] sm:$0xff]   ;;  %v1119_v24 = vld [vmem:[%s1245_s9 + $0x58] sm:$0xff]   ;;  %v1120_v25 = vld [vmem:[%s1245_s9 + $0xc8] sm:$0xff]  }
  0x38   : > { %v1121_v26 = vld [vmem:[%s1245_s9 + $0x60] sm:$0xff]   ;;  %v1122_v27 = vld [vmem:[%s1245_s9 + $0xd0] sm:$0xff]   ;;  %v1123_v28 = vld [vmem:[%s1245_s9 + $0x68] sm:$0xff]  }
  0x39   : > { %v1124_v29 = vld [vmem:[%s1245_s9 + $0xd8] sm:$0xff]  }
  0x3a   : > { %1023 = vmatmul.mubr.msk.bf16.gmra.mrb[4].mxu0 %vm392_vm1, %v1103_v8  ;;  %1051 = vmatmul.mubr.msk.bf16.gmra.mrb[4].mxu1 %vm392_vm1, %v1104_v9 }
  0x3b   : > { %1026 = vmatprep.mubr.msk.bf16.mxu0 %vm392_vm1, %v1105_v10  ;;  %1054 = vmatprep.mubr.msk.bf16.mxu1 %vm392_vm1, %v1106_v11 }
  0x42   : > { %1027 = vmatmul.mubr.msk.bf16.gmra.mrb[8].mxu0 %vm392_vm1, %v1107_v12  ;;  %1055 = vmatmul.mubr.msk.bf16.gmra.mrb[8].mxu1 %vm392_vm1, %v1108_v13 }
  0x43   : > { %1030 = vmatprep.mubr.msk.bf16.mxu0 %vm392_vm1, %v1109_v14  ;;  %1058 = vmatprep.mubr.msk.bf16.mxu1 %vm392_vm1, %v1110_v15 }
  0x4a   : > { %1031 = vmatmul.mubr.msk.bf16.gmra.mrb[12].mxu0 %vm392_vm1, %v1111_v16  ;;  %1059 = vmatmul.mubr.msk.bf16.gmra.mrb[12].mxu1 %vm392_vm1, %v1112_v17 }
  0x4b   : > { %1034 = vmatprep.mubr.msk.bf16.mxu0 %vm392_vm1, %v1113_v18  ;;  %1062 = vmatprep.mubr.msk.bf16.mxu1 %vm392_vm1, %v1114_v19 }
  0x52   : > { %1035 = vmatmul.mubr.msk.bf16.gmra.mrb[16].mxu0 %vm392_vm1, %v1115_v20  ;;  %1063 = vmatmul.mubr.msk.bf16.gmra.mrb[16].mxu1 %vm392_vm1, %v1116_v21 }
  0x53   : > { %1038 = vmatprep.mubr.msk.bf16.mxu0 %vm392_vm1, %v1117_v22  ;;  %1066 = vmatprep.mubr.msk.bf16.mxu1 %vm392_vm1, %v1118_v23 }
  0x5a   : > { %1039 = vmatmul.mubr.msk.bf16.gmra.mrb[20].mxu0 %vm392_vm1, %v1119_v24  ;;  %1067 = vmatmul.mubr.msk.bf16.gmra.mrb[20].mxu1 %vm392_vm1, %v1120_v25 }
  0x5b   : > { %1042 = vmatprep.mubr.msk.bf16.mxu0 %vm392_vm1, %v1121_v26  ;;  %1070 = vmatprep.mubr.msk.bf16.mxu1 %vm392_vm1, %v1122_v27 }
  0x62   : > { %1043 = vmatmul.mubr.msk.bf16.gmra.mrb[24].mxu0 %vm392_vm1, %v1123_v28  ;;  %1071 = vmatmul.mubr.msk.bf16.gmra.mrb[24].mxu1 %vm392_vm1, %v1124_v29 }
 0x105   : > { %v1020_v31 = vpop.f32.mrb[0].mxu0  ;;  %v1048_v33 = vpop.f32.mrb[0].mxu1 }
 0x106   : > { %v524_v32 = vadd.f32 %v1020_v31, %v1303_v30  ;;  %v515_v34 = vpop.f32.mrb[1].mxu0  ;;  %v636_v35 = vadd.f32 %v1048_v33, %v1303_v30  ;;  %v627_v37 = vpop.f32.mrb[1].mxu1 }
 0x107   : > { %v516_v36 = vadd.f32 %v1303_v30, %v515_v34  ;;  %v1021_v38 = vpop.f32.mrb[2].mxu0  ;;  %v628_v40 = vadd.f32 %v1303_v30, %v627_v37  ;;  %v1049_v42 = vpop.f32.mrb[2].mxu1 }
 0x108   : > { %v740_v39 = vmax.f32 %v524_v32, 0.0  ;;  %v527_v41 = vadd.f32 %v1021_v38, %v1303_v30  ;;  %v518_v43 = vpop.f32.mrb[3].mxu0  ;;  %v768_v44 = vmax.f32 %v636_v35, 0.0  ;;  %v639_v46 = vadd.f32 %v1049_v42, %v1303_v30  ;;  %v630_v48 = vpop.f32.mrb[3].mxu1 }
 0x109   : > { %v738_v45 = vmax.f32 %v516_v36, 0.0  ;;  %v519_v47 = vadd.f32 %v1303_v30, %v518_v43  ;;  %v766_v49 = vmax.f32 %v628_v40, 0.0  ;;  %v631_v51 = vadd.f32 %v1303_v30, %v630_v48 }
 0x10a   : > { %797 = vst.msk [vmem:[%s1310_s14 + $0x10] sm:$0xff] %vm794_vm2, %v740_v39  ;;  %v741_v50 = vmax.f32 %v527_v41, 0.0  ;;  %825 = vst.msk [vmem:[%s1310_s14 + $0xf0] sm:$0xff] %vm794_vm2, %v768_v44  ;;  %v769_v52 = vmax.f32 %v639_v46, 0.0 }
 0x10b   : > { %795 = vst.msk [vmem:[%s1310_s14] sm:$0xff] %vm794_vm2, %v738_v45  ;;  %v739_v53 = vmax.f32 %v519_v47, 0.0  ;;  %823 = vst.msk [vmem:[%s1310_s14 + $0xe0] sm:$0xff] %vm794_vm2, %v766_v49  ;;  %v767_v54 = vmax.f32 %v631_v51, 0.0 }
 0x10c   : > { %798 = vst.msk [vmem:[%s1310_s14 + $0x18] sm:$0xff] %vm794_vm2, %v741_v50  ;;  %826 = vst.msk [vmem:[%s1310_s14 + $0xf8] sm:$0xff] %vm794_vm2, %v769_v52 }
 0x10d   : > { %796 = vst.msk [vmem:[%s1310_s14 + $0x8] sm:$0xff] %vm794_vm2, %v739_v53  ;;  %v1024_v55 = vpop.f32.mrb[4].mxu0  ;;  %824 = vst.msk [vmem:[%s1310_s14 + $0xe8] sm:$0xff] %vm794_vm2, %v767_v54  ;;  %v1052_v57 = vpop.f32.mrb[4].mxu1 }
 0x10e   : > { %v540_v56 = vadd.f32 %v1024_v55, %v1303_v30  ;;  %v531_v58 = vpop.f32.mrb[5].mxu0  ;;  %v652_v59 = vadd.f32 %v1052_v57, %v1303_v30  ;;  %v643_v61 = vpop.f32.mrb[5].mxu1 }
 0x10f   : > { %v532_v60 = vadd.f32 %v1303_v30, %v531_v58  ;;  %v1025_v62 = vpop.f32.mrb[6].mxu0  ;;  %v644_v0 = vadd.f32 %v1303_v30, %v643_v61  ;;  %v1053_v2 = vpop.f32.mrb[6].mxu1 }
 0x110   : > { %v744_v63 = vmax.f32 %v540_v56, 0.0  ;;  %v543_v1 = vadd.f32 %v1025_v62, %v1303_v30  ;;  %v534_v3 = vpop.f32.mrb[7].mxu0  ;;  %v772_v4 = vmax.f32 %v652_v59, 0.0  ;;  %v655_v6 = vadd.f32 %v1053_v2, %v1303_v30  ;;  %v646_v8 = vpop.f32.mrb[7].mxu1 }
 0x111   : > { %v742_v5 = vmax.f32 %v532_v60, 0.0  ;;  %v535_v7 = vadd.f32 %v1303_v30, %v534_v3  ;;  %v770_v9 = vmax.f32 %v644_v0, 0.0  ;;  %v647_v11 = vadd.f32 %v1303_v30, %v646_v8 }
 0x112   : > { %801 = vst.msk [vmem:[%s1310_s14 + $0x30] sm:$0xff] %vm794_vm2, %v744_v63  ;;  %v745_v10 = vmax.f32 %v543_v1, 0.0  ;;  %829 = vst.msk [vmem:[%s1310_s14 + $0x110] sm:$0xff] %vm794_vm2, %v772_v4  ;;  %v773_v12 = vmax.f32 %v655_v6, 0.0 }
 0x113   : > { %799 = vst.msk [vmem:[%s1310_s14 + $0x20] sm:$0xff] %vm794_vm2, %v742_v5  ;;  %v743_v13 = vmax.f32 %v535_v7, 0.0  ;;  %827 = vst.msk [vmem:[%s1310_s14 + $0x100] sm:$0xff] %vm794_vm2, %v770_v9  ;;  %v771_v14 = vmax.f32 %v647_v11, 0.0 }
 0x114   : > { %802 = vst.msk [vmem:[%s1310_s14 + $0x38] sm:$0xff] %vm794_vm2, %v745_v10  ;;  %830 = vst.msk [vmem:[%s1310_s14 + $0x118] sm:$0xff] %vm794_vm2, %v773_v12 }
 0x115   : > { %800 = vst.msk [vmem:[%s1310_s14 + $0x28] sm:$0xff] %vm794_vm2, %v743_v13  ;;  %v1028_v15 = vpop.f32.mrb[8].mxu0  ;;  %828 = vst.msk [vmem:[%s1310_s14 + $0x108] sm:$0xff] %vm794_vm2, %v771_v14  ;;  %v1056_v17 = vpop.f32.mrb[8].mxu1 }
 0x116   : > { %v556_v16 = vadd.f32 %v1028_v15, %v1303_v30  ;;  %v547_v18 = vpop.f32.mrb[9].mxu0  ;;  %v668_v19 = vadd.f32 %v1056_v17, %v1303_v30  ;;  %v659_v21 = vpop.f32.mrb[9].mxu1 }
 0x117   : > { %v548_v20 = vadd.f32 %v1303_v30, %v547_v18  ;;  %v1029_v22 = vpop.f32.mrb[10].mxu0  ;;  %v660_v24 = vadd.f32 %v1303_v30, %v659_v21  ;;  %v1057_v26 = vpop.f32.mrb[10].mxu1 }
 0x118   : > { %v748_v23 = vmax.f32 %v556_v16, 0.0  ;;  %v559_v25 = vadd.f32 %v1029_v22, %v1303_v30  ;;  %v550_v27 = vpop.f32.mrb[11].mxu0  ;;  %v776_v28 = vmax.f32 %v668_v19, 0.0  ;;  %v671_v31 = vadd.f32 %v1057_v26, %v1303_v30  ;;  %v662_v33 = vpop.f32.mrb[11].mxu1 }
 0x119   : > { %v746_v29 = vmax.f32 %v548_v20, 0.0  ;;  %v551_v32 = vadd.f32 %v1303_v30, %v550_v27  ;;  %v774_v34 = vmax.f32 %v660_v24, 0.0  ;;  %v663_v36 = vadd.f32 %v1303_v30, %v662_v33 }
 0x11a   : > { %805 = vst.msk [vmem:[%s1310_s14 + $0x50] sm:$0xff] %vm794_vm2, %v748_v23  ;;  %v749_v35 = vmax.f32 %v559_v25, 0.0  ;;  %833 = vst.msk [vmem:[%s1310_s14 + $0x130] sm:$0xff] %vm794_vm2, %v776_v28  ;;  %v777_v37 = vmax.f32 %v671_v31, 0.0 }
 0x11b   : > { %803 = vst.msk [vmem:[%s1310_s14 + $0x40] sm:$0xff] %vm794_vm2, %v746_v29  ;;  %v747_v38 = vmax.f32 %v551_v32, 0.0  ;;  %831 = vst.msk [vmem:[%s1310_s14 + $0x120] sm:$0xff] %vm794_vm2, %v774_v34  ;;  %v775_v39 = vmax.f32 %v663_v36, 0.0 }
 0x11c   : > { %806 = vst.msk [vmem:[%s1310_s14 + $0x58] sm:$0xff] %vm794_vm2, %v749_v35  ;;  %834 = vst.msk [vmem:[%s1310_s14 + $0x138] sm:$0xff] %vm794_vm2, %v777_v37 }
 0x11d   : > { %804 = vst.msk [vmem:[%s1310_s14 + $0x48] sm:$0xff] %vm794_vm2, %v747_v38  ;;  %v1032_v40 = vpop.f32.mrb[12].mxu0  ;;  %832 = vst.msk [vmem:[%s1310_s14 + $0x128] sm:$0xff] %vm794_vm2, %v775_v39  ;;  %v1060_v42 = vpop.f32.mrb[12].mxu1 }
 0x11e   : > { %v572_v41 = vadd.f32 %v1032_v40, %v1303_v30  ;;  %v563_v43 = vpop.f32.mrb[13].mxu0  ;;  %v684_v44 = vadd.f32 %v1060_v42, %v1303_v30  ;;  %v675_v46 = vpop.f32.mrb[13].mxu1 }
 0x11f   : > { %v564_v45 = vadd.f32 %v1303_v30, %v563_v43  ;;  %v1033_v47 = vpop.f32.mrb[14].mxu0  ;;  %v676_v49 = vadd.f32 %v1303_v30, %v675_v46  ;;  %v1061_v51 = vpop.f32.mrb[14].mxu1 }
 0x120   : > { %v752_v48 = vmax.f32 %v572_v41, 0.0  ;;  %v575_v50 = vadd.f32 %v1033_v47, %v1303_v30  ;;  %v566_v52 = vpop.f32.mrb[15].mxu0  ;;  %v780_v53 = vmax.f32 %v684_v44, 0.0  ;;  %v687_v55 = vadd.f32 %v1061_v51, %v1303_v30  ;;  %v678_v57 = vpop.f32.mrb[15].mxu1 }
 0x121   : > { %v750_v54 = vmax.f32 %v564_v45, 0.0  ;;  %v567_v56 = vadd.f32 %v1303_v30, %v566_v52  ;;  %v778_v58 = vmax.f32 %v676_v49, 0.0  ;;  %v679_v60 = vadd.f32 %v1303_v30, %v678_v57 }
 0x122   : > { %809 = vst.msk [vmem:[%s1310_s14 + $0x70] sm:$0xff] %vm794_vm2, %v752_v48  ;;  %v753_v59 = vmax.f32 %v575_v50, 0.0  ;;  %837 = vst.msk [vmem:[%s1310_s14 + $0x150] sm:$0xff] %vm794_vm2, %v780_v53  ;;  %v781_v61 = vmax.f32 %v687_v55, 0.0 }
 0x123   : > { %807 = vst.msk [vmem:[%s1310_s14 + $0x60] sm:$0xff] %vm794_vm2, %v750_v54  ;;  %v751_v62 = vmax.f32 %v567_v56, 0.0  ;;  %835 = vst.msk [vmem:[%s1310_s14 + $0x140] sm:$0xff] %vm794_vm2, %v778_v58  ;;  %v779_v63 = vmax.f32 %v679_v60, 0.0 }
 0x124   : > { %810 = vst.msk [vmem:[%s1310_s14 + $0x78] sm:$0xff] %vm794_vm2, %v753_v59  ;;  %838 = vst.msk [vmem:[%s1310_s14 + $0x158] sm:$0xff] %vm794_vm2, %v781_v61 }
 0x125   : > { %808 = vst.msk [vmem:[%s1310_s14 + $0x68] sm:$0xff] %vm794_vm2, %v751_v62  ;;  %v1036_v0 = vpop.f32.mrb[16].mxu0  ;;  %836 = vst.msk [vmem:[%s1310_s14 + $0x148] sm:$0xff] %vm794_vm2, %v779_v63  ;;  %v1064_v2 = vpop.f32.mrb[16].mxu1 }
 0x126   : > { %v588_v1 = vadd.f32 %v1036_v0, %v1303_v30  ;;  %v579_v3 = vpop.f32.mrb[17].mxu0  ;;  %v700_v4 = vadd.f32 %v1064_v2, %v1303_v30  ;;  %v691_v6 = vpop.f32.mrb[17].mxu1 }
 0x127   : > { %v580_v5 = vadd.f32 %v1303_v30, %v579_v3  ;;  %v1037_v7 = vpop.f32.mrb[18].mxu0  ;;  %v692_v9 = vadd.f32 %v1303_v30, %v691_v6  ;;  %v1065_v11 = vpop.f32.mrb[18].mxu1 }
 0x128   : > { %v756_v8 = vmax.f32 %v588_v1, 0.0  ;;  %v591_v10 = vadd.f32 %v1037_v7, %v1303_v30  ;;  %v582_v12 = vpop.f32.mrb[19].mxu0  ;;  %v784_v13 = vmax.f32 %v700_v4, 0.0  ;;  %v703_v15 = vadd.f32 %v1065_v11, %v1303_v30  ;;  %v694_v17 = vpop.f32.mrb[19].mxu1 }
 0x129   : > { %v754_v14 = vmax.f32 %v580_v5, 0.0  ;;  %v583_v16 = vadd.f32 %v1303_v30, %v582_v12  ;;  %v782_v18 = vmax.f32 %v692_v9, 0.0  ;;  %v695_v20 = vadd.f32 %v1303_v30, %v694_v17 }
 0x12a   : > { %813 = vst.msk [vmem:[%s1310_s14 + $0x90] sm:$0xff] %vm794_vm2, %v756_v8  ;;  %v757_v19 = vmax.f32 %v591_v10, 0.0  ;;  %841 = vst.msk [vmem:[%s1310_s14 + $0x170] sm:$0xff] %vm794_vm2, %v784_v13  ;;  %v785_v21 = vmax.f32 %v703_v15, 0.0 }
 0x12b   : > { %811 = vst.msk [vmem:[%s1310_s14 + $0x80] sm:$0xff] %vm794_vm2, %v754_v14  ;;  %v755_v22 = vmax.f32 %v583_v16, 0.0  ;;  %839 = vst.msk [vmem:[%s1310_s14 + $0x160] sm:$0xff] %vm794_vm2, %v782_v18  ;;  %v783_v23 = vmax.f32 %v695_v20, 0.0 }
 0x12c   : > { %814 = vst.msk [vmem:[%s1310_s14 + $0x98] sm:$0xff] %vm794_vm2, %v757_v19  ;;  %842 = vst.msk [vmem:[%s1310_s14 + $0x178] sm:$0xff] %vm794_vm2, %v785_v21 }
 0x12d   : > { %812 = vst.msk [vmem:[%s1310_s14 + $0x88] sm:$0xff] %vm794_vm2, %v755_v22  ;;  %v1040_v24 = vpop.f32.mrb[20].mxu0  ;;  %840 = vst.msk [vmem:[%s1310_s14 + $0x168] sm:$0xff] %vm794_vm2, %v783_v23  ;;  %v1068_v26 = vpop.f32.mrb[20].mxu1 }
 0x12e   : > { %v604_v25 = vadd.f32 %v1040_v24, %v1303_v30  ;;  %v595_v27 = vpop.f32.mrb[21].mxu0  ;;  %v716_v28 = vadd.f32 %v1068_v26, %v1303_v30  ;;  %v707_v31 = vpop.f32.mrb[21].mxu1 }
 0x12f   : > { %v596_v29 = vadd.f32 %v1303_v30, %v595_v27  ;;  %v1041_v32 = vpop.f32.mrb[22].mxu0  ;;  %v708_v34 = vadd.f32 %v1303_v30, %v707_v31  ;;  %v1069_v36 = vpop.f32.mrb[22].mxu1 }
 0x130   : > { %v760_v33 = vmax.f32 %v604_v25, 0.0  ;;  %v607_v35 = vadd.f32 %v1041_v32, %v1303_v30  ;;  %v598_v37 = vpop.f32.mrb[23].mxu0  ;;  %v788_v38 = vmax.f32 %v716_v28, 0.0  ;;  %v719_v40 = vadd.f32 %v1069_v36, %v1303_v30  ;;  %v710_v42 = vpop.f32.mrb[23].mxu1 }
 0x131   : > { %v758_v39 = vmax.f32 %v596_v29, 0.0  ;;  %v599_v41 = vadd.f32 %v1303_v30, %v598_v37  ;;  %v786_v43 = vmax.f32 %v708_v34, 0.0  ;;  %v711_v45 = vadd.f32 %v1303_v30, %v710_v42 }
 0x132   : > { %817 = vst.msk [vmem:[%s1310_s14 + $0xb0] sm:$0xff] %vm794_vm2, %v760_v33  ;;  %v761_v44 = vmax.f32 %v607_v35, 0.0  ;;  %845 = vst.msk [vmem:[%s1310_s14 + $0x190] sm:$0xff] %vm794_vm2, %v788_v38  ;;  %v789_v46 = vmax.f32 %v719_v40, 0.0 }
 0x133   : > { %815 = vst.msk [vmem:[%s1310_s14 + $0xa0] sm:$0xff] %vm794_vm2, %v758_v39  ;;  %v759_v47 = vmax.f32 %v599_v41, 0.0  ;;  %843 = vst.msk [vmem:[%s1310_s14 + $0x180] sm:$0xff] %vm794_vm2, %v786_v43  ;;  %v787_v48 = vmax.f32 %v711_v45, 0.0 }
 0x134   : > { %818 = vst.msk [vmem:[%s1310_s14 + $0xb8] sm:$0xff] %vm794_vm2, %v761_v44  ;;  %846 = vst.msk [vmem:[%s1310_s14 + $0x198] sm:$0xff] %vm794_vm2, %v789_v46 }
 0x135   : > { %816 = vst.msk [vmem:[%s1310_s14 + $0xa8] sm:$0xff] %vm794_vm2, %v759_v47  ;;  %v1044_v49 = vpop.f32.mrb[24].mxu0  ;;  %844 = vst.msk [vmem:[%s1310_s14 + $0x188] sm:$0xff] %vm794_vm2, %v787_v48  ;;  %v1072_v51 = vpop.f32.mrb[24].mxu1 }
 0x136   : > { %v620_v50 = vadd.f32 %v1044_v49, %v1303_v30  ;;  %v611_v52 = vpop.f32.mrb[25].mxu0  ;;  %v732_v53 = vadd.f32 %v1072_v51, %v1303_v30  ;;  %v723_v55 = vpop.f32.mrb[25].mxu1 }
 0x137   : > { %v612_v54 = vadd.f32 %v1303_v30, %v611_v52  ;;  %v1045_v56 = vpop.f32.mrb[26].mxu0  ;;  %v724_v58 = vadd.f32 %v1303_v30, %v723_v55  ;;  %v1073_v60 = vpop.f32.mrb[26].mxu1 }
 0x138   : > { %v764_v57 = vmax.f32 %v620_v50, 0.0  ;;  %v623_v59 = vadd.f32 %v1045_v56, %v1303_v30  ;;  %v614_v61 = vpop.f32.mrb[27].mxu0  ;;  %v792_v62 = vmax.f32 %v732_v53, 0.0  ;;  %v735_v0 = vadd.f32 %v1073_v60, %v1303_v30  ;;  %v726_v2 = vpop.f32.mrb[27].mxu1 }
 0x139   : > { %v762_v63 = vmax.f32 %v612_v54, 0.0  ;;  %v615_v1 = vadd.f32 %v1303_v30, %v614_v61  ;;  %v790_v3 = vmax.f32 %v724_v58, 0.0  ;;  %v727_v5 = vadd.f32 %v1303_v30, %v726_v2 }
 0x13a   : > { %821 = vst.msk [vmem:[%s1310_s14 + $0xd0] sm:$0xff] %vm794_vm2, %v764_v57  ;;  %v765_v4 = vmax.f32 %v623_v59, 0.0  ;;  %849 = vst.msk [vmem:[%s1310_s14 + $0x1b0] sm:$0xff] %vm794_vm2, %v792_v62  ;;  %v793_v6 = vmax.f32 %v735_v0, 0.0 }
 0x13b   : > { %819 = vst.msk [vmem:[%s1310_s14 + $0xc0] sm:$0xff] %vm794_vm2, %v762_v63  ;;  %v763_v7 = vmax.f32 %v615_v1, 0.0  ;;  %847 = vst.msk [vmem:[%s1310_s14 + $0x1a0] sm:$0xff] %vm794_vm2, %v790_v3  ;;  %v791_v8 = vmax.f32 %v727_v5, 0.0 }
 0x13c   : > { %822 = vst.msk [vmem:[%s1310_s14 + $0xd8] sm:$0xff] %vm794_vm2, %v765_v4  ;;  %850 = vst.msk [vmem:[%s1310_s14 + $0x1b8] sm:$0xff] %vm794_vm2, %v793_v6 }
 0x13d   : > { %820 = vst.msk [vmem:[%s1310_s14 + $0xc8] sm:$0xff] %vm794_vm2, %v763_v7  ;;  %848 = vst.msk [vmem:[%s1310_s14 + $0x1a8] sm:$0xff] %vm794_vm2, %v791_v8 }
 0x13e PF: > { %s14_s12 = sadd.s32 1, %s1163_s12  }
 0x13f   : > { %p11_p2 = scmp.ge.s32.totalorder %s14_s12, 16  }
 0x141   :  { %13 = sbr.rel (!%p11_p2) target bundleno = 1 (0x1), region = 67 }
 0x148   :  { %873 = vsyncpa [#allocation3], 1 }
 0x149   :  { %875 = vsyncpa [#allocation3 + $0x1], 1 }

</bundles_post_ra>
